<compile_context>
chip_gen: v6e
topology: v6e:2x2x1
jax: 0.10.0
libtpu: 0.0.40
codegen_flags: <defaults>
</compile_context>

<pallas_src>
import functools

import jax
import jax.numpy as jnp
from jax.experimental import pallas as pl
from jax.experimental.pallas import tpu as pltpu


_MAX_BLOCK_BYTES = 8 * 1024 * 1024       # <= 8 MiB per input per grid step
_VMEM_LIMIT_BYTES = 48 * 1024 * 1024     # 32 MiB resident (2 in x 2 bufs x 8 MiB) + headroom;
                                         # raises v5e's 16 MiB default, fits v7x's 64 MiB VMEM.


def _mse_partial_kernel(x_ref, t_ref, out_ref, *, block_rows, blocks_per_slot,
                        rows_total, needs_mask):
    """Accumulate sum((x - t)^2) along the reduction grid axis into a
    lane-wide f32 accumulator row of this slot's resident output block."""
    s = pl.program_id(0)   # TensorCore slot ("parallel")
    j = pl.program_id(1)   # reduction step ("arbitrary")

    @pl.when(j == 0)
    def _():
        out_ref[...] = jnp.zeros_like(out_ref)

    # Cast before subtracting (better numerics for low-precision inputs).
    x = x_ref[...].astype(jnp.float32)
    t = t_ref[...].astype(jnp.float32)
    d = x - t
    d2 = d * d

    if needs_mask:
        # The final (or clamped duplicate) block may extend past the real row
        # count: zero those rows so they contribute nothing to the sum.
        row_start = (s * blocks_per_slot + j) * block_rows
        valid_rows = rows_total - row_start
        row_ids = jax.lax.broadcasted_iota(jnp.int32, d2.shape, 0)
        d2 = jnp.where(row_ids < valid_rows, d2, 0.0)

    # Lane-wide f32 accumulation; the scalar reduce happens once, outside.
    out_ref[0:1, :] += jnp.sum(d2, axis=0, keepdims=True)


def mse_loss(x: jax.Array, target: jax.Array) -> jax.Array:
    """mean((x - target)**2) computed in a Pallas TPU kernel."""
    assert x.shape == target.shape, "ContentLoss requires matching shapes"
    n = int(x.size)
    itemsize = jnp.dtype(x.dtype).itemsize

    xf = x.reshape(-1)
    tf = target.reshape(-1)

    # Lane-dense view without any data movement: pick the widest lane width
    # (multiple of 128) that divides n, so the reshape is a free bitcast.
    lane = next((c for c in (512, 256, 128) if n % c == 0), None)
    if lane is None:
        # Rare fallback: flattened size not a multiple of 128 (never the case
        # for typical conv feature maps). Padded zeros contribute 0 to the sum
        # of squares and we still divide by the true n.
        lane = 128
        padded = pl.cdiv(n, lane) * lane
        xf = jnp.pad(xf, (0, padded - n))
        tf = jnp.pad(tf, (0, padded - n))

    rows_total = int(xf.size) // lane
    x2 = xf.reshape(rows_total, lane)
    t2 = tf.reshape(rows_total, lane)

    # Block size: biggest tile that stays <= 8 MiB per input per step.
    max_rows = max(8, _MAX_BLOCK_BYTES // (lane * itemsize))
    if rows_total <= max_rows:
        block_rows = rows_total                    # single full-extent block
    else:
        block_rows = (max_rows // 8) * 8           # keep (8, 128) alignment
    total_blocks = pl.cdiv(rows_total, block_rows)

    # Two TensorCore slots on the "parallel" axis (used by v7x megacore).
    num_slots = 2 if total_blocks >= 2 else 1
    blocks_per_slot = pl.cdiv(total_blocks, num_slots)
    needs_mask = (num_slots * blocks_per_slot * block_rows) != rows_total
    last_block = total_blocks - 1

    def in_index_map(s, j):
        # Clamp so a fully out-of-range trailing block (odd block count split
        # over 2 slots) just re-reads the last valid block; the kernel masks
        # its rows to zero contribution.
        return (jnp.minimum(s * blocks_per_slot + j, last_block), 0)

    kernel = functools.partial(
        _mse_partial_kernel,
        block_rows=block_rows,
        blocks_per_slot=blocks_per_slot,
        rows_total=rows_total,
        needs_mask=needs_mask,
    )

    cost = pl.CostEstimate(
        flops=3 * n,                                   # sub, mul, add / element
        transcendentals=0,
        bytes_accessed=2 * n * itemsize + num_slots * 8 * lane * 4,
    )

    partials = pl.pallas_call(
        kernel,
        out_shape=jax.ShapeDtypeStruct((num_slots * 8, lane), jnp.float32),
        grid=(num_slots, blocks_per_slot),
        in_specs=[
            pl.BlockSpec((block_rows, lane), in_index_map),
            pl.BlockSpec((block_rows, lane), in_index_map),
        ],
        out_specs=pl.BlockSpec((8, lane), lambda s, j: (s, 0)),
        compiler_params=pltpu.CompilerParams(
            dimension_semantics=("parallel", "arbitrary"),
            vmem_limit_bytes=_VMEM_LIMIT_BYTES,
        ),
        cost_estimate=cost,
    )(x2, t2)

    # Tiny final reduction over the per-slot partial sums; single 1/N scale.
    return jnp.sum(partials) * (1.0 / float(n))


def content_loss(x: jax.Array, target: jax.Array):
    """Pallas equivalent of ContentLoss.forward: returns (input, loss)."""
    # TODO(synk): PyTorch stores the loss as module state (self.loss); here it
    # is returned alongside the unchanged input instead.
    loss = mse_loss(x, target)
    return x, loss


if __name__ == "__main__":
    # Small feature-map shape consistent with the module's usage.
    N, C, H, W = 2, 4, 16, 16
    key = jax.random.PRNGKey(0)
    k1, k2 = jax.random.split(key)
    x = jax.random.uniform(k1, (N, C, H, W), dtype=jnp.float32)
    target = jax.random.uniform(k2, (N, C, H, W), dtype=jnp.float32)

    out, loss = content_loss(x, target)
    out = jax.block_until_ready(out)
    loss = jax.block_until_ready(loss)

    # Reference checks.
    ref_loss = jnp.mean((x - target) ** 2)
    assert out.shape == x.shape
    assert bool(jnp.array_equal(out, x))                       # identity pass-through
    assert bool(jnp.allclose(loss, ref_loss, atol=1e-6, rtol=1e-5))

    print("KERNEL_OK")
</pallas_src>

<mosaic_0001>
module attributes {stable_mosaic.version = 11 : i64} {
  func.func @_mse_partial_kernel(%arg0: i32, %arg1: i32, %arg2: memref<4x512xf32, #tpu.memory_space<vmem>>, %arg3: memref<4x512xf32, #tpu.memory_space<vmem>>, %arg4: memref<8x512xf32, #tpu.memory_space<vmem>>) attributes {dimension_semantics = [#tpu.dimension_semantics<parallel>, #tpu.dimension_semantics<arbitrary>], iteration_bounds = array<i64: 1, 1>, scalar_prefetch = 0 : i64, scratch_operands = 0 : i64, tpu.core_type = #tpu.core_type<tc>, window_params = [{transform_indices = @transform_0, window_bounds = array<i64: 4, 512>}, {transform_indices = @transform_1, window_bounds = array<i64: 4, 512>}, {transform_indices = @transform_2, window_bounds = array<i64: 8, 512>}]} {
    %c0_i32 = arith.constant 0 : i32
    %0 = arith.cmpi eq, %arg1, %c0_i32 : i32
    %1 = arith.extui %0 : i1 to i32
    %c0_i32_0 = arith.constant 0 : i32
    %2 = arith.cmpi ne, %1, %c0_i32_0 : i32
    scf.if %2 {
      %cst_8 = arith.constant 0.000000e+00 : f32
      %12 = vector.broadcast %cst_8 : f32 to vector<8x512xf32>
      %c0_9 = arith.constant 0 : index
      %c0_10 = arith.constant 0 : index
      %13 = vector.load %arg4[%c0_9, %c0_10] : memref<8x512xf32, #tpu.memory_space<vmem>>, vector<8x512xf32>
      tpu.vector_store %arg4[%c0_9, %c0_10], %12 {strides = array<i32>} : memref<8x512xf32, #tpu.memory_space<vmem>>, vector<8x512xf32>,
    } else {
    }
    %c0 = arith.constant 0 : index
    %c0_1 = arith.constant 0 : index
    %3 = vector.load %arg2[%c0, %c0_1] : memref<4x512xf32, #tpu.memory_space<vmem>>, vector<4x512xf32>
    %c0_2 = arith.constant 0 : index
    %c0_3 = arith.constant 0 : index
    %4 = vector.load %arg3[%c0_2, %c0_3] : memref<4x512xf32, #tpu.memory_space<vmem>>, vector<4x512xf32>
    %5 = arith.subf %3, %4 : vector<4x512xf32>
    %6 = arith.mulf %5, %5 : vector<4x512xf32>
    %c0_4 = arith.constant 0 : index
    %c0_5 = arith.constant 0 : index
    %7 = vector.load %arg4[%c0_4, %c0_5] : memref<8x512xf32, #tpu.memory_space<vmem>>, vector<1x512xf32>
    %cst = arith.constant dense<0.000000e+00> : vector<512xf32>
    %8 = vector.multi_reduction <add>, %6, %cst [0] : vector<4x512xf32> to vector<512xf32>
    %9 = vector.shape_cast %8 : vector<512xf32> to vector<1x512xf32>
    %10 = arith.addf %7, %9 : vector<1x512xf32>
    %c0_6 = arith.constant 0 : index
    %c0_7 = arith.constant 0 : index
    %11 = vector.load %arg4[%c0_6, %c0_7] : memref<8x512xf32, #tpu.memory_space<vmem>>, vector<1x512xf32>
    tpu.vector_store %arg4[%c0_6, %c0_7], %10 {strides = array<i32>} : memref<8x512xf32, #tpu.memory_space<vmem>>, vector<1x512xf32>,
    return
  }
  func.func @transform_0(%arg0: i32, %arg1: i32) -> (i32, i32) {
    %c1_i32 = arith.constant 1 : i32
    %0 = arith.muli %arg0, %c1_i32 : i32
    %1 = arith.addi %0, %arg1 : i32
    %c0_i32 = arith.constant 0 : i32
    %2 = arith.minsi %1, %c0_i32 : i32
    %c0_i32_0 = arith.constant 0 : i32
    %c0_i32_1 = arith.constant 0 : i32
    return %2, %c0_i32_0 : i32, i32
  }
  func.func @transform_1(%arg0: i32, %arg1: i32) -> (i32, i32) {
    %c1_i32 = arith.constant 1 : i32
    %0 = arith.muli %arg0, %c1_i32 : i32
    %1 = arith.addi %0, %arg1 : i32
    %c0_i32 = arith.constant 0 : i32
    %2 = arith.minsi %1, %c0_i32 : i32
    %c0_i32_0 = arith.constant 0 : i32
    %c0_i32_1 = arith.constant 0 : i32
    return %2, %c0_i32_0 : i32, i32
  }
  func.func @transform_2(%arg0: i32, %arg1: i32) -> (i32, i32) {
    %c0_i32 = arith.constant 0 : i32
    %c0_i32_0 = arith.constant 0 : i32
    return %arg0, %c0_i32 : i32, i32
  }
}

</mosaic_0001>

<bundles_post_ra>
// kernel: tpu_custom_call.1
= control target key start
LH: loop header
LB: loop body
LE: loop exit
PB: predicated region body
PF: predicated region fallthrough
CT: control target
= control target key end

     0   :  { %7 = vsyncpa [#allocation3], 0  ;;  %s262_s0 = inlined_call_operand.hbm [shape: f32[4,512], index: 0, kind: input, shape index: {}]   ;;  %s263_s1 = inlined_call_operand.hbm [shape: f32[4,512], index: 1, kind: input, shape index: {}]   ;;  %s264_s2 = inlined_call_operand.hbm [shape: f32[8,512], index: 2, kind: output, shape index: {}]  }
   0x1   :  { %8 = vsyncpa [#allocation6], 0 }
   0x2   :  { %9 = vsyncpa [#allocation4], 0  ;;  %s233_s9 = smov [#allocation2]   ;;  %s234_s11 = smov [#allocation5]  }
   0x3   :  { %s22_s10 = sshll.u32 %s233_s9, 4  ;;  %s38_s12 = sshll.u32 %s234_s11, 4  ;;  %s23_s10 = int_to_ptr.vmem [resolvable:$true] %s22_s10  ;;  %s39_s12 = int_to_ptr.vmem [resolvable:$true] %s38_s12 }
   0x4   :  { %s175_s13 = scalar_lea.vmem %s23_s10, 256  ;;  %p180_p1 = scmp.lt.s32.totalorder %s23_s10, %s23_s10 }
   0x5   :  { %p176_p0 = scmp.ne.s32.totalorder %s23_s10, %s175_s13  ;;  %p181_p2 = scmp.lt.s32.totalorder %s175_s13, %s175_s13 }
   0x7   :  { %p182_p3 = por %p181_p2, %p180_p1 }
   0x9   :  { %p183_p4 = pnand %p182_p3, %p176_p0 }
   0xb   :  { %186 = shalt.err (!%p183_p4)
}
   0xc   :  { %25 = dma.hbm_to_vmem [thread:$0]  %s262_s0, 256, %s23_s10, [#allocation3]  }
   0xd   :  { %s195_s16 = scalar_lea.vmem %s39_s12, 256  ;;  %p200_p6 = scmp.lt.s32.totalorder %s39_s12, %s39_s12 }
   0xe   :  { %p196_p5 = scmp.ne.s32.totalorder %s39_s12, %s195_s16  ;;  %p201_p7 = scmp.lt.s32.totalorder %s195_s16, %s195_s16 }
  0x10   :  { %p202_p8 = por %p201_p7, %p200_p6 }
  0x12   :  { %p203_p9 = pnand %p202_p8, %p196_p5 }
  0x14   :  { %206 = shalt.err (!%p203_p9)
}
  0x15   :  { %41 = dma.hbm_to_vmem [thread:$0]  %s263_s1, 256, %s39_s12, [#allocation6]  }
  0x16   :  { %227 = dma.done.wait [#allocation3], 256  }
  0x17   :  { %228 = vsyncadd [#allocation3], 4294967040 }
  0x18   :  { %229 = dma.done.wait [#allocation6], 256  }
  0x19   :  { %230 = vsyncadd [#allocation6], 4294967040  ;;  %v235_v0 = vmov 0.0   ;;  %v62_v1 = vld [vmem:[#allocation2] sm:$0xff]  ;;  %v63_v2 = vld [vmem:[#allocation2 + $0x8] sm:$0xff]  ;;  %vm77_vm0 = vcmask 1043456   ;;  %v115_v25 = vlaneseq }
  0x1a   :  { %58 = vst [vmem:[#allocation7] sm:$0xff] %v235_v0  ;;  %59 = vst [vmem:[#allocation7 + $0x8] sm:$0xff] %v235_v0  ;;  %v64_v3 = vld [vmem:[#allocation5] sm:$0xff]  ;;  %v65_v4 = vld [vmem:[#allocation5 + $0x8] sm:$0xff]  ;;  %v236_v23 = vmov 1966171168  }
  0x1b   :  { %60 = vst [vmem:[#allocation7 + $0x10] sm:$0xff] %v235_v0  ;;  %61 = vst [vmem:[#allocation7 + $0x18] sm:$0xff] %v235_v0  ;;  %v66_v5 = vsub.f32 %v62_v1, %v64_v3  ;;  %v67_v6 = vsub.f32 %v63_v2, %v65_v4  ;;  %v113_v24 = vunpack.c.l.s4 %v236_v23  ;;  %v116_v35 = vshrl.u32 %v115_v25, 7  ;;  %s237_s0 = smov [#allocation7]  }
  0x1c   :  { %s148_s1 = sshll.u32 %s237_s0, 4  ;;  %vm138_vm1 = vcmp.lt.s32.totalorder %v115_v25, 512  ;;  %s149_s1 = int_to_ptr.vmem [resolvable:$true] %s148_s1 }
  0x1d   :  { %v68_v7 = vmul.f32 %v66_v5, %v66_v5  ;;  %v69_v8 = vmul.f32 %v67_v6, %v67_v6  ;;  %v114_v34 = vunpack.c.0.s8 %v113_v24  ;;  %s207_s19 = scalar_lea.vmem %s149_s1, 512  ;;  %p212_p11 = scmp.lt.s32.totalorder %s149_s1, %s149_s1 }
  0x1e   :  { %p208_p10 = scmp.ne.s32.totalorder %s149_s1, %s207_s19  ;;  %p213_p12 = scmp.lt.s32.totalorder %s207_s19, %s207_s19 }
  0x1f   :  { %v73_v9 = vcombine.high %v68_v7, %v68_v7  ;;  %v78_v10 = vsel %vm77_vm0, %v68_v7, 0.0  ;;  %v74_v11 = vcombine.high %v69_v8, %v69_v8  ;;  %v92_v13 = vsel %vm77_vm0, %v69_v8, 0.0 }
  0x20   :  { %v79_v12 = vrot.slane %v78_v10, 4  ;;  %v93_v15 = vrot.slane %v92_v13, 4  ;;  %v117_v43 = vsub.s32 %v114_v34, %v116_v35  ;;  %p214_p13 = por %p213_p12, %p212_p11 }
  0x21   :  { %v85_v14 = vsel %vm77_vm0, %v73_v9, 0.0  ;;  %v99_v18 = vsel %vm77_vm0, %v74_v11, 0.0 }
  0x22   :  { %v80_v16 = vadd.f32 %v79_v12, %v78_v10  ;;  %v86_v17 = vrot.slane %v85_v14, 4  ;;  %v94_v19 = vadd.f32 %v93_v15, %v92_v13  ;;  %v100_v20 = vrot.slane %v99_v18, 4  ;;  %v70_v50 = vld [vmem:[#allocation7] ss:$8 sm:$0xf]  ;;  %p215_p0 = pnand %p214_p13, %p208_p10 }
  0x24   :  { %v81_v21 = vrot.slane %v80_v16, 2  ;;  %v87_v22 = vadd.f32 %v86_v17, %v85_v14  ;;  %v95_v26 = vrot.slane %v94_v19, 2  ;;  %v101_v27 = vadd.f32 %v100_v20, %v99_v18 }
  0x26   :  { %v82_v28 = vadd.f32 %v81_v21, %v80_v16  ;;  %v88_v29 = vrot.slane %v87_v22, 2  ;;  %v96_v30 = vadd.f32 %v95_v26, %v94_v19  ;;  %v102_v31 = vrot.slane %v101_v27, 2 }
  0x28   :  { %v83_v32 = vrot.slane %v82_v28, 1  ;;  %v89_v33 = vadd.f32 %v88_v29, %v87_v22  ;;  %v97_v36 = vrot.slane %v96_v30, 1  ;;  %v103_v37 = vadd.f32 %v102_v31, %v101_v27 }
  0x2a   :  { %v84_v38 = vadd.f32 %v83_v32, %v82_v28  ;;  %v90_v39 = vrot.slane %v89_v33, 1  ;;  %v98_v40 = vadd.f32 %v97_v36, %v96_v30  ;;  %v104_v41 = vrot.slane %v103_v37, 1 }
  0x2c   :  { %v91_v42 = vadd.f32 %v90_v39, %v89_v33  ;;  %v105_v44 = vadd.f32 %v104_v41, %v103_v37 }
  0x2e   :  { %v110_v45 = vcombine.low %v84_v38, %v91_v42  ;;  %v111_v46 = vcombine.low %v98_v40, %v105_v44 }
  0x30   :  { %v118_v47 = vrot.slane %v110_v45, %v117_v43  ;;  %v125_v48 = vrot.slane %v111_v46, %v117_v43 }
  0x32   :  { %v126_v49 = vcombine.low %v118_v47, %v125_v48 }
  0x34   :  { %v133_v51 = vrot.slane %v126_v49, %v117_v43 }
  0x36   :  { %v135_v52 = vadd.f32 %v133_v51, %v70_v50 }
  0x38   :  { %140 = vst.msk [vmem:[#allocation7] ss:$8 sm:$0xf] %vm138_vm1, %v135_v52 }
  0x39   :  { %218 = shalt.err (!%p215_p0)
}
  0x3a   :  { %151 = dma.vmem_to_hbm [thread:$0]  %s149_s1, 512, %s264_s2, [#allocation4]  }
  0x3b   :  { %231 = dma.done.wait [#allocation4], 512  }
  0x3c   :  { %232 = vsyncadd [#allocation4], 4294966784 }
  0x3d   :  { %155 = vsyncpa [#allocation3], 1 }
  0x3e   :  { %156 = vsyncpa [#allocation6], 1 }
  0x3f   :  { %157 = vsyncpa [#allocation4], 1 }

</bundles_post_ra>
